<compile_context>
chip_gen: v5e
topology: v5e:2x2
jax: 0.10.0
libtpu: 0.0.40
codegen_flags: <defaults>
</compile_context>

<pallas_src>
import jax
import jax.numpy as jnp
from jax.experimental import pallas as pl
from jax.experimental.pallas import tpu as pltpu


def tlm_kernel(x_ref, w_ref, bconv_ref, wfc_ref, bfc_ref, o_ref):
    """One fused step: 3-tap conv (3 bf16 MXU matmuls with in-kernel time
    shifts), temporal max-pool, bias + ReLU, and the padded FC head.

    x_ref:     (Bt, T, F)  bf16  input block
    w_ref:     (3, F, H)   bf16  conv weights, tap-major (0: t-1, 1: t, 2: t+1)
    bconv_ref: (1, H)      f32   conv bias
    wfc_ref:   (H, CPAD)   bf16  fc weight (transposed, zero-padded lanes)
    bfc_ref:   (1, CPAD)   f32   fc bias (zero-padded)
    o_ref:     (Bt, CPAD)  f32   logits (padded classes)
    """
    bt, t, f = x_ref.shape
    h = w_ref.shape[2]
    n_rows = bt * t

    x2d = x_ref[...].reshape(n_rows, f)             # free view (T multiple of 8/16)

    # Center tap: one big MXU matmul, f32 accumulation.
    acc = jnp.dot(x2d, w_ref[1], preferred_element_type=jnp.float32)   # (Bt*T, H)

    # Shifted taps: sublane roll + boundary mask replaces wrapper-side im2col.
    # Rolls are done in f32 (exact, since bf16 values are representable in f32).
    xf = x2d.astype(jnp.float32)
    # time index of each row within its batch element (built without int division)
    tpos = jax.lax.broadcasted_iota(jnp.int32, (bt, t, f), 1).reshape(n_rows, f)

    # tap 0: row r gets x[r-1]  (== x[b, t-1]); zero-pad at t == 0
    x_m1 = pltpu.roll(xf, shift=1, axis=0)
    x_m1 = jnp.where(tpos == 0, 0.0, x_m1)
    acc = acc + jnp.dot(x_m1.astype(jnp.bfloat16), w_ref[0],
                        preferred_element_type=jnp.float32)

    # tap 2: row r gets x[r+1]  (== x[b, t+1]); zero-pad at t == T-1
    x_p1 = pltpu.roll(xf, shift=n_rows - 1, axis=0)   # positive shift == -1 mod n
    x_p1 = jnp.where(tpos == t - 1, 0.0, x_p1)
    acc = acc + jnp.dot(x_p1.astype(jnp.bfloat16), w_ref[2],
                        preferred_element_type=jnp.float32)

    # AdaptiveMaxPool1d(1) over time, then bias + ReLU (equivalent ordering:
    # bias is constant over t and ReLU is monotone).
    pooled = jnp.max(acc.reshape(bt, t, h), axis=1)                    # (Bt, H) f32
    pooled = jnp.maximum(pooled + bconv_ref[...], 0.0)

    # Fused FC head on the lane-padded class dim -> dense (Bt, 128) store.
    logits = jnp.dot(pooled.astype(wfc_ref.dtype), wfc_ref[...],
                     preferred_element_type=jnp.float32) + bfc_ref[...]
    o_ref[...] = logits.astype(o_ref.dtype)


def _choose_batch_tile(B, T, target_m=512, max_bt=256):
    """Pick the per-step batch tile Bt so the MXU sees M = Bt*T >= target_m rows.
    Awkward B is padded up to a multiple of Bt rather than shrinking Bt."""
    bt = -(-target_m // T)                 # ceil(target_m / T)
    bt = max(1, min(bt, max_bt))
    if B <= bt:
        return B, B                        # single grid step; block == full array
    bt = ((bt + 7) // 8) * 8               # multiple of 8 -> dense sublane tiling
    b_pad = ((B + bt - 1) // bt) * bt      # B > bt here => grid >= 2 (v7x: both TCs)
    return bt, b_pad


def temporal_localization_forward(x, w_conv, b_conv, w_fc, b_fc):
    """x: [B, T, F]. Params in PyTorch conventions:
       w_conv [H, F, 3], b_conv [H], w_fc [C, H], b_fc [C]. Returns [B, C] f32."""
    B, T, F = x.shape
    H = w_conv.shape[0]
    C = w_fc.shape[0]
    CPAD = ((C + 127) // 128) * 128        # lane-dense padded class dim

    # Layout constraints of this kernel (hold for the module's intended sizes).
    # TODO(synk): pad T / F / H up to these multiples to support arbitrary shapes.
    assert T % 8 == 0 and F % 128 == 0 and H % 128 == 0

    # bf16 matmul operands (half the DMA, native-rate MXU); f32 accumulation in-kernel.
    x_bf = x.astype(jnp.bfloat16)
    w_k = jnp.transpose(w_conv, (2, 1, 0)).astype(jnp.bfloat16)        # (3, F, H)
    b_k = b_conv.reshape(1, H).astype(jnp.float32)
    w_fc_p = jnp.zeros((H, CPAD), jnp.bfloat16).at[:, :C].set(
        w_fc.T.astype(jnp.bfloat16))
    b_fc_p = jnp.zeros((1, CPAD), jnp.float32).at[0, :C].set(
        b_fc.astype(jnp.float32))

    Bt, B_pad = _choose_batch_tile(B, T)
    if B_pad != B:
        x_bf = jnp.concatenate(
            [x_bf, jnp.zeros((B_pad - B, T, F), x_bf.dtype)], axis=0)

    grid = (B_pad // Bt,)
    out = pl.pallas_call(
        tlm_kernel,
        out_shape=jax.ShapeDtypeStruct((B_pad, CPAD), jnp.float32),
        grid_spec=pltpu.PrefetchScalarGridSpec(
            num_scalar_prefetch=0,
            grid=grid,
            in_specs=[
                pl.BlockSpec((Bt, T, F), lambda i: (i, 0, 0)),
                pl.BlockSpec((3, F, H), lambda i: (0, 0, 0)),
                pl.BlockSpec((1, H), lambda i: (0, 0)),
                pl.BlockSpec((H, CPAD), lambda i: (0, 0)),
                pl.BlockSpec((1, CPAD), lambda i: (0, 0)),
            ],
            out_specs=pl.BlockSpec((Bt, CPAD), lambda i: (i, 0)),
        ),
        compiler_params=pltpu.CompilerParams(
            dimension_semantics=("parallel",)),
    )(x_bf, w_k, b_k, w_fc_p, b_fc_p)

    return out[:B, :C]


def reference_forward(x, w_conv, b_conv, w_fc, b_fc):
    """Pure-JAX f32 reference mirroring the PyTorch module."""
    xt = jnp.transpose(x, (0, 2, 1))                          # [B, F, T] (NCW)
    conv = jax.lax.conv_general_dilated(
        xt, w_conv, window_strides=(1,), padding=((1, 1),),
        dimension_numbers=("NCH", "OIH", "NCH"))
    conv = jnp.maximum(conv + b_conv[None, :, None], 0.0)
    pooled = jnp.max(conv, axis=-1)                           # [B, H]
    return pooled @ w_fc.T + b_fc


if __name__ == "__main__":
    B, T, F, H, C = 2, 16, 128, 128, 8   # batch, window, feature_dim, hidden_dim, classes
    key = jax.random.PRNGKey(0)
    kx, kx2, kw1, kb1, kw2, kb2 = jax.random.split(key, 6)
    w_conv = jax.random.normal(kw1, (H, F, 3), jnp.float32) * 0.02
    b_conv = jax.random.normal(kb1, (H,), jnp.float32) * 0.02
    w_fc = jax.random.normal(kw2, (C, H), jnp.float32) * 0.02
    b_fc = jax.random.normal(kb2, (C,), jnp.float32) * 0.02

    # Small-batch path (single grid step, Bt == B).
    x = jax.random.normal(kx, (B, T, F), jnp.float32)
    out = jax.block_until_ready(
        temporal_localization_forward(x, w_conv, b_conv, w_fc, b_fc))
    ref = reference_forward(x, w_conv, b_conv, w_fc, b_fc)
    assert out.shape == (B, C)
    assert jnp.allclose(out, ref, atol=2e-2, rtol=2e-2), "mismatch vs reference (B=2)"

    # Larger-batch path (Bt=32 tile, batch padded 40->64, grid of 2 -> both v7x TCs).
    B2 = 40
    x2 = jax.random.normal(kx2, (B2, T, F), jnp.float32)
    out2 = jax.block_until_ready(
        temporal_localization_forward(x2, w_conv, b_conv, w_fc, b_fc))
    ref2 = reference_forward(x2, w_conv, b_conv, w_fc, b_fc)
    assert out2.shape == (B2, C)
    assert jnp.allclose(out2, ref2, atol=2e-2, rtol=2e-2), "mismatch vs reference (B=40)"

    print("KERNEL_OK")
</pallas_src>

<mosaic_0001>
module attributes {stable_mosaic.version = 11 : i64} {
  func.func @tlm_kernel(%arg0: i32, %arg1: memref<2x16x128xbf16, #tpu.memory_space<vmem>>, %arg2: memref<3x128x128xbf16, #tpu.memory_space<vmem>>, %arg3: memref<1x128xf32, #tpu.memory_space<vmem>>, %arg4: memref<128x128xbf16, #tpu.memory_space<vmem>>, %arg5: memref<1x128xf32, #tpu.memory_space<vmem>>, %arg6: memref<2x128xf32, #tpu.memory_space<vmem>>) attributes {dimension_semantics = [#tpu.dimension_semantics<parallel>], iteration_bounds = array<i64: 1>, scalar_prefetch = 0 : i64, scratch_operands = 0 : i64, tpu.core_type = #tpu.core_type<tc>, window_params = [{transform_indices = @transform_0, window_bounds = array<i64: 2, 16, 128>}, {pipeline_mode = #tpu.pipeline_mode<synchronous>, transform_indices = @transform_1, window_bounds = array<i64: 3, 128, 128>}, {pipeline_mode = #tpu.pipeline_mode<synchronous>, transform_indices = @transform_2, window_bounds = array<i64: 1, 128>}, {pipeline_mode = #tpu.pipeline_mode<synchronous>, transform_indices = @transform_3, window_bounds = array<i64: 128, 128>}, {pipeline_mode = #tpu.pipeline_mode<synchronous>, transform_indices = @transform_4, window_bounds = array<i64: 1, 128>}, {transform_indices = @transform_5, window_bounds = array<i64: 2, 128>}]} {
    %c0 = arith.constant 0 : index
    %c0_0 = arith.constant 0 : index
    %c0_1 = arith.constant 0 : index
    %0 = vector.load %arg1[%c0, %c0_0, %c0_1] : memref<2x16x128xbf16, #tpu.memory_space<vmem>>, vector<2x16x128xbf16>
    %1 = vector.shape_cast %0 : vector<2x16x128xbf16> to vector<32x128xbf16>
    %c1 = arith.constant 1 : index
    %c0_2 = arith.constant 0 : index
    %c0_3 = arith.constant 0 : index
    %2 = vector.load %arg2[%c1, %c0_2, %c0_3] : memref<3x128x128xbf16, #tpu.memory_space<vmem>>, vector<1x128x128xbf16>
    %3 = vector.shape_cast %2 : vector<1x128x128xbf16> to vector<128x128xbf16>
    %cst = arith.constant dense<0.000000e+00> : vector<32x128xf32>
    %4 = tpu.matmul %1, %3, %cst {dimension_numbers = #tpu.dot_dimension_numbers<[1], [0], [0], [1], [0, 0, 1, 1], [], []>} : vector<32x128xbf16>, vector<128x128xbf16>, vector<32x128xf32> -> vector<32x128xf32>
    %5 = arith.extf %1 : vector<32x128xbf16> to vector<32x128xf32>
    %6 = tpu.iota {dimensions = array<i32: 1>} : vector<2x16x128xi32>
    %7 = vector.shape_cast %6 : vector<2x16x128xi32> to vector<32x128xi32>
    %c1_i32 = arith.constant 1 : i32
    %8 = tpu.dynamic_rotate %5 by %c1_i32 dim 0 : vector<32x128xf32>, i32 -> vector<32x128xf32>
    %c0_i32 = arith.constant 0 : i32
    %9 = vector.broadcast %c0_i32 : i32 to vector<32x128xi32>
    %10 = arith.cmpi eq, %7, %9 : vector<32x128xi32>
    %cst_4 = arith.constant 0.000000e+00 : f32
    %11 = vector.broadcast %cst_4 : f32 to vector<32x128xf32>
    %12 = arith.select %10, %11, %8 : vector<32x128xi1>, vector<32x128xf32>
    %13 = arith.truncf %12 : vector<32x128xf32> to vector<32x128xbf16>
    %c0_5 = arith.constant 0 : index
    %c0_6 = arith.constant 0 : index
    %c0_7 = arith.constant 0 : index
    %14 = vector.load %arg2[%c0_5, %c0_6, %c0_7] : memref<3x128x128xbf16, #tpu.memory_space<vmem>>, vector<1x128x128xbf16>
    %15 = vector.shape_cast %14 : vector<1x128x128xbf16> to vector<128x128xbf16>
    %cst_8 = arith.constant dense<0.000000e+00> : vector<32x128xf32>
    %16 = tpu.matmul %13, %15, %cst_8 {dimension_numbers = #tpu.dot_dimension_numbers<[1], [0], [0], [1], [0, 0, 1, 1], [], []>} : vector<32x128xbf16>, vector<128x128xbf16>, vector<32x128xf32> -> vector<32x128xf32>
    %17 = arith.addf %4, %16 : vector<32x128xf32>
    %c31_i32 = arith.constant 31 : i32
    %18 = tpu.dynamic_rotate %5 by %c31_i32 dim 0 : vector<32x128xf32>, i32 -> vector<32x128xf32>
    %c15_i32 = arith.constant 15 : i32
    %19 = vector.broadcast %c15_i32 : i32 to vector<32x128xi32>
    %20 = arith.cmpi eq, %7, %19 : vector<32x128xi32>
    %cst_9 = arith.constant 0.000000e+00 : f32
    %21 = vector.broadcast %cst_9 : f32 to vector<32x128xf32>
    %22 = arith.select %20, %21, %18 : vector<32x128xi1>, vector<32x128xf32>
    %23 = arith.truncf %22 : vector<32x128xf32> to vector<32x128xbf16>
    %c2 = arith.constant 2 : index
    %c0_10 = arith.constant 0 : index
    %c0_11 = arith.constant 0 : index
    %24 = vector.load %arg2[%c2, %c0_10, %c0_11] : memref<3x128x128xbf16, #tpu.memory_space<vmem>>, vector<1x128x128xbf16>
    %25 = vector.shape_cast %24 : vector<1x128x128xbf16> to vector<128x128xbf16>
    %cst_12 = arith.constant dense<0.000000e+00> : vector<32x128xf32>
    %26 = tpu.matmul %23, %25, %cst_12 {dimension_numbers = #tpu.dot_dimension_numbers<[1], [0], [0], [1], [0, 0, 1, 1], [], []>} : vector<32x128xbf16>, vector<128x128xbf16>, vector<32x128xf32> -> vector<32x128xf32>
    %27 = arith.addf %17, %26 : vector<32x128xf32>
    %28 = vector.shape_cast %27 : vector<32x128xf32> to vector<2x16x128xf32>
    %cst_13 = arith.constant dense<0xFF800000> : vector<2x128xf32>
    %29 = vector.multi_reduction <maximumf>, %28, %cst_13 [1] : vector<2x16x128xf32> to vector<2x128xf32>
    %c0_14 = arith.constant 0 : index
    %c0_15 = arith.constant 0 : index
    %30 = vector.load %arg3[%c0_14, %c0_15] : memref<1x128xf32, #tpu.memory_space<vmem>>, vector<1x128xf32>
    %31 = vector.broadcast %30 : vector<1x128xf32> to vector<2x128xf32>
    %32 = arith.addf %29, %31 : vector<2x128xf32>
    %cst_16 = arith.constant 0.000000e+00 : f32
    %33 = vector.broadcast %cst_16 : f32 to vector<2x128xf32>
    %34 = arith.maximumf %32, %33 : vector<2x128xf32>
    %35 = arith.truncf %34 : vector<2x128xf32> to vector<2x128xbf16>
    %c0_17 = arith.constant 0 : index
    %c0_18 = arith.constant 0 : index
    %36 = vector.load %arg4[%c0_17, %c0_18] : memref<128x128xbf16, #tpu.memory_space<vmem>>, vector<128x128xbf16>
    %cst_19 = arith.constant dense<0.000000e+00> : vector<2x128xf32>
    %37 = tpu.matmul %35, %36, %cst_19 {dimension_numbers = #tpu.dot_dimension_numbers<[1], [0], [0], [1], [0, 0, 1, 1], [], []>} : vector<2x128xbf16>, vector<128x128xbf16>, vector<2x128xf32> -> vector<2x128xf32>
    %c0_20 = arith.constant 0 : index
    %c0_21 = arith.constant 0 : index
    %38 = vector.load %arg5[%c0_20, %c0_21] : memref<1x128xf32, #tpu.memory_space<vmem>>, vector<1x128xf32>
    %39 = vector.broadcast %38 : vector<1x128xf32> to vector<2x128xf32>
    %40 = arith.addf %37, %39 : vector<2x128xf32>
    %c0_22 = arith.constant 0 : index
    %c0_23 = arith.constant 0 : index
    %41 = vector.load %arg6[%c0_22, %c0_23] : memref<2x128xf32, #tpu.memory_space<vmem>>, vector<2x128xf32>
    tpu.vector_store %arg6[%c0_22, %c0_23], %40 {strides = array<i32>} : memref<2x128xf32, #tpu.memory_space<vmem>>, vector<2x128xf32>,
    return
  }
  func.func @transform_0(%arg0: i32) -> (i32, i32, i32) {
    %c0_i32 = arith.constant 0 : i32
    %c0_i32_0 = arith.constant 0 : i32
    %c0_i32_1 = arith.constant 0 : i32
    return %arg0, %c0_i32, %c0_i32_0 : i32, i32, i32
  }
  func.func @transform_1(%arg0: i32) -> (i32, i32, i32) {
    %c0_i32 = arith.constant 0 : i32
    %c0_i32_0 = arith.constant 0 : i32
    %c0_i32_1 = arith.constant 0 : i32
    %c0_i32_2 = arith.constant 0 : i32
    return %c0_i32, %c0_i32_0, %c0_i32_1 : i32, i32, i32
  }
  func.func @transform_2(%arg0: i32) -> (i32, i32) {
    %c0_i32 = arith.constant 0 : i32
    %c0_i32_0 = arith.constant 0 : i32
    %c0_i32_1 = arith.constant 0 : i32
    return %c0_i32, %c0_i32_0 : i32, i32
  }
  func.func @transform_3(%arg0: i32) -> (i32, i32) {
    %c0_i32 = arith.constant 0 : i32
    %c0_i32_0 = arith.constant 0 : i32
    %c0_i32_1 = arith.constant 0 : i32
    return %c0_i32, %c0_i32_0 : i32, i32
  }
  func.func @transform_4(%arg0: i32) -> (i32, i32) {
    %c0_i32 = arith.constant 0 : i32
    %c0_i32_0 = arith.constant 0 : i32
    %c0_i32_1 = arith.constant 0 : i32
    return %c0_i32, %c0_i32_0 : i32, i32
  }
  func.func @transform_5(%arg0: i32) -> (i32, i32) {
    %c0_i32 = arith.constant 0 : i32
    %c0_i32_0 = arith.constant 0 : i32
    return %arg0, %c0_i32 : i32, i32
  }
}

</mosaic_0001>

<bundles_post_ra>
// kernel: tpu_custom_call.1
= control target key start
LH: loop header
LB: loop body
LE: loop exit
PB: predicated region body
PF: predicated region fallthrough
CT: control target
= control target key end

     0   :  { %10 = vsyncpa [#allocation3], 0  ;;  %s883_s0 = inlined_call_operand.hbm [shape: bf16[2,16,128], index: 0, kind: input, shape index: {}]   ;;  %s884_s1 = inlined_call_operand.hbm [shape: bf16[3,128,128], index: 1, kind: input, shape index: {}]   ;;  %s885_s2 = inlined_call_operand.vmem [shape: f32[1,128], index: 2, kind: input, shape index: {}]   ;;  %s886_s3 = inlined_call_operand.hbm [shape: bf16[128,128], index: 3, kind: input, shape index: {}]   ;;  %s887_s4 = inlined_call_operand.vmem [shape: f32[1,128], index: 4, kind: input, shape index: {}]   ;;  %s888_s5 = inlined_call_operand.hbm [shape: f32[2,128], index: 5, kind: output, shape index: {}]  }
   0x1   :  { %11 = vsyncpa [#allocation6], 0 }
   0x2   :  { %12 = vsyncpa [#allocation4], 0  ;;  %s30_s20 = sshll.u32 %s884_s1, 4  ;;  %s812_s21 = smov [#allocation5]   ;;  %s31_s20 = int_to_ptr.hbm [resolvable:$true] %s30_s20 }
   0x3   :  { %s32_s22 = sshll.u32 %s812_s21, 4  ;;  %s17_s25 = sshll.u32 %s883_s0, 4  ;;  %s33_s22 = int_to_ptr.vmem [resolvable:$true] %s32_s22  ;;  %s18_s25 = int_to_ptr.hbm [resolvable:$true] %s17_s25 }
   0x4   :  { %s813_s26 = smov 64   ;;  %s814_s27 = smov 4  }
   0x5   :  { %38 = dma.hbm_to_vmem [thread:$0]  %s31_s20, 3072, %s33_s22, [#allocation6], %s813_s26, %s813_s26, %s814_s27  }
   0x6   :  { %s815_s28 = smov [#allocation2]   ;;  %s45_s7 = sshll.u32 %s886_s3, 4  ;;  %s46_s7 = int_to_ptr.hbm [resolvable:$true] %s45_s7 }
   0x7   :  { %s19_s29 = sshll.u32 %s815_s28, 4  ;;  %s816_s1 = smov [#allocation7]   ;;  %s20_s29 = int_to_ptr.vmem [resolvable:$true] %s19_s29 }
   0x8   :  { %25 = dma.hbm_to_vmem [thread:$0]  %s18_s25, 256, %s20_s29, [#allocation3], %s813_s26, %s813_s26, %s814_s27  }
   0x9   :  { %s47_s8 = sshll.u32 %s816_s1, 4  ;;  %s48_s8 = int_to_ptr.vmem [resolvable:$true] %s47_s8 }
   0xa   :  { %53 = dma.hbm_to_vmem [thread:$0]  %s46_s7, 1024, %s48_s8, [#allocation6], %s813_s26, %s813_s26, %s814_s27  }
   0xb   :  { %806 = dma.done.wait [#allocation3], 256  }
   0xc   :  { %807 = vsyncadd [#allocation3], 4294967040 }
   0xd   :  { %808 = dma.done.wait [#allocation6], 4096  }
   0xe   :  { %809 = vsyncadd [#allocation6], 4294963200  ;;  %v682_v0 = vld [vmem:[#allocation5 + $0x38] sm:$0xff]  ;;  %v681_v3 = vld [vmem:[#allocation5 + $0x30] sm:$0xff]  ;;  %v93_v17 = vlaneseq  ;;  %vm817_vm4 = vmmov 1   ;;  %vm429_vm7 = vcmask 1041409  }
   0xf   :  { %v674_v1 = vld [vmem:[#allocation5 + $0x78] sm:$0xff]  ;;  %177 = vmatpush.bf16.msra.mxu0 %v682_v0  ;;  %v673_v4 = vld [vmem:[#allocation5 + $0x70] sm:$0xff]  ;;  %v680_v6 = vld [vmem:[#allocation5 + $0x28] sm:$0xff]  ;;  %s502_s14 = sshll.u32 %s888_s5, 4  ;;  %s503_s14 = int_to_ptr.hbm [resolvable:$true] %s502_s14 }
  0x10   :  { %v690_v2 = vld [vmem:[#allocation5 + $0xb8] sm:$0xff]  ;;  %256 = vmatpush.bf16.msra.mxu1 %v674_v1  ;;  %v689_v5 = vld [vmem:[#allocation5 + $0xb0] sm:$0xff]  ;;  %v672_v7 = vld [vmem:[#allocation5 + $0x68] sm:$0xff]  ;;  %v94_v24 = vshrl.u32 %v93_v17, 7 }
  0x11   :  { %357 = vmatpush.bf16.msra.mxu2 %v690_v2  ;;  %v688_v8 = vld [vmem:[#allocation5 + $0xa8] sm:$0xff]  ;;  %v679_v9 = vld [vmem:[#allocation5 + $0x20] sm:$0xff]  ;;  %v678_v12 = vld [vmem:[#allocation5 + $0x18] sm:$0xff] }
  0x12   :  { %v671_v10 = vld [vmem:[#allocation5 + $0x60] sm:$0xff]  ;;  %v670_v13 = vld [vmem:[#allocation5 + $0x58] sm:$0xff]  ;;  %v68_v15 = vld [vmem:[#allocation2] sm:$0xff]   ;;  %vm100_vm0 = vcmp.lt.s32.totalorder %v94_v24, 1  ;;  %v95_v35 = vadd.s32 8, %v94_v24  ;;  %vm279_vm1 = vcmp.lt.s32.totalorder %v94_v24, 7 }
  0x13   :  { %178 = vmatpush.bf16.msra.mxu0 %v681_v3  ;;  %v687_v11 = vld [vmem:[#allocation5 + $0xa0] sm:$0xff]  ;;  %v686_v14 = vld [vmem:[#allocation5 + $0x98] sm:$0xff]  ;;  %v677_v18 = vld [vmem:[#allocation5 + $0x10] sm:$0xff]  ;;  %v89_v20 = vunpack.c.l.bf16 %v68_v15  ;;  %v90_v21 = vunpack.c.h.bf16 %v68_v15  ;;  %vm699_vm2 = vcmp.ne.s32.totalorder %v94_v24, 0 }
  0x14   :  { %257 = vmatpush.bf16.msra.mxu1 %v673_v4  ;;  %v71_v16 = vld [vmem:[#allocation2 + $0x8] sm:$0xff]   ;;  %v669_v19 = vld [vmem:[#allocation5 + $0x50] sm:$0xff]  ;;  %v676_v26 = vld [vmem:[#allocation5 + $0x8] sm:$0xff]  ;;  %vm700_vm3 = vcmp.ne.s32.totalorder %v95_v35, 15 }
  0x15   :  { %358 = vmatpush.bf16.msra.mxu2 %v689_v5  ;;  %v92_v22 = vunpack.c.h.bf16 %v71_v16  ;;  %v685_v23 = vld [vmem:[#allocation5 + $0x90] sm:$0xff]  ;;  %v91_v25 = vunpack.c.l.bf16 %v71_v16  ;;  %v668_v27 = vld [vmem:[#allocation5 + $0x48] sm:$0xff]  ;;  %v96_v28 = vrot.slane %v89_v20, 7  ;;  %v97_v29 = vrot.slane %v90_v21, 7  ;;  %v675_v36 = vld [vmem:[#allocation5] sm:$0xff] }
  0x16   :  { %v684_v31 = vld [vmem:[#allocation5 + $0x88] sm:$0xff]  ;;  %v275_v32 = vrot.slane %v89_v20, 1  ;;  %v276_v33 = vrot.slane %v90_v21, 1  ;;  %v667_v37 = vld [vmem:[#allocation5 + $0x40] sm:$0xff]  ;;  %v665_v44 = vld [vmem:[#allocation2] sm:$0xff] }
  0x17   :  { %179 = vmatpush.bf16.msra.mxu0 %v680_v6  ;;  %v99_v30 = vrot.slane %v92_v22, 7  ;;  %v277_v34 = vrot.slane %v91_v25, 1  ;;  %v103_v38 = vsel %vm100_vm0, %v96_v28, %v97_v29  ;;  %v683_v40 = vld [vmem:[#allocation5 + $0x80] sm:$0xff]  ;;  %vm862_vm5 = vmpackc.low %vm817_vm4, %vm699_vm2  ;;  %v98_v47 = vrot.slane %v91_v25, 7  ;;  %v666_v54 = vld [vmem:[#allocation2 + $0x8] sm:$0xff] }
  0x18   :  { %258 = vmatpush.bf16.msra.mxu1 %v672_v7  ;;  %v282_v42 = vsel %vm279_vm1, %v275_v32, %v276_v33  ;;  %vm626_vm6 = vmpackc.low %vm700_vm3, %vm817_vm4  ;;  %v278_v48 = vrot.slane %v92_v22, 1  ;;  %v698_v56 = vld [vmem:[#allocation7 + $0x38] sm:$0xff]  ;;  %v697_v59 = vld [vmem:[#allocation7 + $0x30] sm:$0xff] }
  0x19   :  { %359 = vmatpush.bf16.msra.mxu2 %v688_v8  ;;  %v104_v39 = vsel %vm100_vm0, %v99_v30, %v96_v28  ;;  %v281_v41 = vsel %vm279_vm1, %v276_v33, %v277_v34  ;;  %v101_v49 = vsel %vm100_vm0, %v98_v47, %v99_v30  ;;  %v102_v50 = vsel %vm100_vm0, %v97_v29, %v98_v47  ;;  %v696_v60 = vld [vmem:[#allocation7 + $0x28] sm:$0xff]  ;;  %v695_v0 = vld [vmem:[#allocation7 + $0x20] sm:$0xff]  ;;  %v694_v2 = vld [vmem:[#allocation7 + $0x18] sm:$0xff] }
  0x1a   :  { %v547_v43 = vpack.c.bf16 %v103_v38, %v104_v39  ;;  %v627_v46 = vpack.c.bf16 %v281_v41, %v282_v42  ;;  %v280_v51 = vsel %vm279_vm1, %v277_v34, %v278_v48  ;;  %v283_v52 = vsel %vm279_vm1, %v278_v48, %v275_v32  ;;  %481 = vmatpush.bf16.msra.mxu3 %v698_v56  ;;  %v693_v4 = vld [vmem:[#allocation7 + $0x10] sm:$0xff] }
  0x1b   :  { %180 = vmatpush.bf16.msra.mxu0 %v679_v9  ;;  %v551_v53 = vpack.c.bf16 %v101_v49, %v102_v50  ;;  %v631_v55 = vpack.c.bf16 %v283_v52, %v280_v51 }
  0x1c   :  { %259 = vmatpush.bf16.msra.mxu1 %v671_v10 }
  0x1d   :  { %360 = vmatpush.bf16.msra.mxu2 %v687_v11  ;;  %v692_v11 = vld [vmem:[#allocation7 + $0x8] sm:$0xff] }
  0x1e   :  { %482 = vmatpush.bf16.msra.mxu3 %v697_v59 }
  0x1f   :  { %181 = vmatpush.bf16.msra.mxu0 %v678_v12 }
  0x20   :  { %260 = vmatpush.bf16.msra.mxu1 %v670_v13  ;;  %v691_v13 = vld [vmem:[#allocation7] sm:$0xff] }
  0x21   :  { %361 = vmatpush.bf16.msra.mxu2 %v686_v14 }
  0x22   :  { %483 = vmatpush.bf16.msra.mxu3 %v696_v60 }
  0x23   :  { %182 = vmatpush.bf16.msra.mxu0 %v677_v18 }
  0x24   :  { %261 = vmatpush.bf16.msra.mxu1 %v669_v19 }
  0x25   :  { %362 = vmatpush.bf16.msra.mxu2 %v685_v23 }
  0x26   :  { %484 = vmatpush.bf16.msra.mxu3 %v695_v0 }
  0x27   :  { %183 = vmatpush.bf16.msra.mxu0 %v676_v26 }
  0x28   :  { %262 = vmatpush.bf16.msra.mxu1 %v668_v27 }
  0x29   :  { %363 = vmatpush.bf16.msra.mxu2 %v684_v31  ;;  %v708_v31 = vld [vmem:[%s885_s2] ss:$0 sm:$0xff]  ;;  %s818_s2 = smov [#allocation8]  }
  0x2a   :  { %485 = vmatpush.bf16.msra.mxu3 %v694_v2  ;;  %s500_s11 = sshll.u32 %s818_s2, 4  ;;  %s501_s11 = int_to_ptr.vmem [resolvable:$true] %s500_s11 }
  0x2b   :  { %184 = vmatpush.bf16.msra.mxu0 %v675_v36 }
  0x2c   :  { %263 = vmatpush.bf16.msra.mxu1 %v667_v37 }
  0x2d   :  { %364 = vmatpush.bf16.msra.mxu2 %v683_v40 }
  0x2e   :  { %548 = vmatmul.msk.bf16.vlgmr.msra.gmra.mxu0 %vm862_vm5, %v547_v43  ;;  %486 = vmatpush.bf16.msra.mxu3 %v693_v4 }
  0x2f   :  { %264 = vmatmul.bf16.vlgmr.msra.gmra.mxu1 %v665_v44 }
  0x30   :  { %628 = vmatmul.msk.bf16.vlgmr.msra.gmra.mxu2 %vm626_vm6, %v627_v46  ;;  %v709_v46 = vld [vmem:[%s887_s4] ss:$0 sm:$0xff] }
  0x32   :  { %487 = vmatpush.bf16.msra.mxu3 %v692_v11 }
  0x36   :  { %488 = vmatpush.bf16.msra.mxu3 %v691_v13 }
  0x3e   :  { %552 = vmatmul.msk.bf16.gmra.mxu0 %vm862_vm5, %v551_v53 }
  0x3f   :  { %269 = vmatmul.bf16.gmra.mxu1 %v666_v54 }
  0x40   :  { %632 = vmatmul.msk.bf16.gmra.mxu2 %vm626_vm6, %v631_v55 }
  0xab   :  { %v186_v57 = vpop.f32.mrf.mxu0 }
  0xac   :  { %v265_v58 = vpop.f32.mrf.mxu1 }
  0xad   :  { %v266_v1 = vadd.f32 %v265_v58, %v186_v57 }
  0xb3   :  { %v366_v61 = vpop.f32.mrf.mxu2  ;;  %v188_v62 = vpop.f32.mrf.mxu0 }
  0xb4   :  { %v267_v63 = vpop.f32.mrf.mxu1  ;;  %v376_v6 = vadd.f32 %v366_v61, %v266_v1 }
  0xb5   :  { %v268_v3 = vadd.f32 %v267_v63, %v188_v62 }
  0xbb   :  { %v368_v5 = vpop.f32.mrf.mxu2  ;;  %v191_v8 = vpop.f32.mrf.mxu0 }
  0xbc   :  { %v377_v7 = vadd.f32 %v368_v5, %v268_v3  ;;  %v270_v9 = vpop.f32.mrf.mxu1 }
  0xbd   :  { %v271_v19 = vadd.f32 %v270_v9, %v191_v8 }
  0xbe   :  { %v380_v10 = vmax.f32 %v376_v6, %v377_v7 }
  0xc0   :  { %v381_v12 = vrot.slane %v380_v10, 4 }
  0xc2   :  { %v382_v15 = vmax.f32 %v380_v10, %v381_v12 }
  0xc3   :  { %v371_v14 = vpop.f32.mrf.mxu2  ;;  %v193_v16 = vpop.f32.mrf.mxu0 }
  0xc4   :  { %v272_v17 = vpop.f32.mrf.mxu1  ;;  %v383_v18 = vrot.slane %v382_v15, 2  ;;  %v378_v23 = vadd.f32 %v371_v14, %v271_v19 }
  0xc5   :  { %v273_v20 = vadd.f32 %v272_v17, %v193_v16 }
  0xc6   :  { %v384_v22 = vmax.f32 %v382_v15, %v383_v18 }
  0xc8   :  { %v385_v26 = vrot.slane %v384_v22, 1 }
  0xca   :  { %v386_v29 = vmax.f32 %v384_v22, %v385_v26 }
  0xcb   :  { %v373_v21 = vpop.f32.mrf.mxu2 }
  0xcc   :  { %v379_v24 = vadd.f32 %v373_v21, %v273_v20  ;;  %v398_v34 = vadd.f32 %v708_v31, %v386_v29 }
  0xce   :  { %v387_v25 = vmax.f32 %v378_v23, %v379_v24  ;;  %v400_v37 = vmax.f32 %v398_v34, 0.0 }
  0xd0   :  { %v388_v27 = vrot.slane %v387_v25, 4  ;;  %v402_v39 = vpack.c.bf16 %v400_v37, %v400_v37 }
  0xd2   :  { %v389_v28 = vmax.f32 %v387_v25, %v388_v27  ;;  %v426_v42 = vunpack.c.l.b16 %v402_v39 }
  0xd4   :  { %v390_v30 = vrot.slane %v389_v28, 2 }
  0xd6   :  { %v391_v32 = vmax.f32 %v389_v28, %v390_v30 }
  0xd8   :  { %v392_v33 = vrot.slane %v391_v32, 1 }
  0xda   :  { %v393_v35 = vmax.f32 %v391_v32, %v392_v33 }
  0xdc   :  { %v399_v36 = vadd.f32 %v708_v31, %v393_v35 }
  0xde   :  { %v401_v38 = vmax.f32 %v399_v36, 0.0 }
  0xe0   :  { %v403_v40 = vpack.c.bf16 %v401_v38, %v401_v38 }
  0xe2   :  { %v427_v41 = vunpack.c.l.b16 %v403_v40 }
  0xe4   :  { %v428_v43 = vrot.slane %v427_v41, 7 }
  0xe6   :  { %v430_v44 = vsel %vm429_vm7, %v428_v43, %v426_v42 }
  0xe7   :  { %v431_v45 = vpack.c.b16 %v430_v44, %v430_v44 }
  0xe9   :  { %489 = vmatmul.bf16.vlgmr.msra.gmra.mxu3 %v431_v45 }
 0x16c   :  { %v490_v47 = vpop.f32.mrf.mxu3 }
 0x16d   :  { %v491_v48 = vadd.f32 %v709_v46, %v490_v47 }
 0x16f   :  { %494 = vst [vmem:[#allocation8] sm:$0x3] %v491_v48 }
 0x170   :  { %505 = dma.vmem_to_hbm [thread:$0]  %s501_s11, 32, %s503_s14, [#allocation4]  }
 0x174   :  { %v492_v49 = vpop.f32.mrf.mxu3 }
 0x175   :  { %810 = dma.done.wait [#allocation4], 32  }
 0x176   :  { %811 = vsyncadd [#allocation4], 4294967264 }
 0x177   :  { %510 = vsyncpa [#allocation3], 1 }
 0x178   :  { %511 = vsyncpa [#allocation6], 1 }
 0x179   :  { %512 = vsyncpa [#allocation4], 1 }

</bundles_post_ra>
